<compile_context>
chip_gen: v5e
topology: v5e:2x2
jax: 0.10.0
libtpu: 0.0.40
codegen_flags: <defaults>
</compile_context>

<pallas_src>
import math
import functools
import numpy as np
import jax
import jax.numpy as jnp
from jax.experimental import pallas as pl
from jax.experimental.pallas import tpu as pltpu

# ----------------------------- hyper-parameters ------------------------------
N = 16                 # N_mesh (spatial grid)
DATA_CHANNEL = 1
P = 30                 # number of branch/trunk basis coefficients
TRUNK_FEATUREPAIR = 1
FC_BRANCH = [100, 100, 100, 100]
FC_TRUNK = [100, 100, 100, 100]
DATA_NORM_RMS = 1.0
BATCH = 2

LANE = 128             # TPU lane width: every feature axis is padded to this
SUBLANE = 8
NUM_HIDDEN = len(FC_BRANCH)              # 4 tanh hidden layers
MAX_TB = 512                             # preferred (max) batch-tile rows


# ------------------------------ parameter init -------------------------------
def _xavier(key, fan_in, fan_out):
    limit = math.sqrt(6.0 / (fan_in + fan_out))
    return jax.random.uniform(key, (fan_in, fan_out), jnp.float32, -limit, limit)


def init_params(key):
    """Deterministic synthetic parameters.

    Weights are stored transposed relative to torch.nn.Linear, i.e. (in, out),
    so every layer computes x @ W + b.  Biases are stored as (1, out).
    """
    branch_dims = [N * DATA_CHANNEL] + FC_BRANCH + [P]
    trunk_dims = [DATA_CHANNEL * 2 * TRUNK_FEATUREPAIR] + FC_TRUNK + [P]
    params = {"branch": [], "trunk": []}
    for i in range(len(branch_dims) - 1):
        key, kw, kb = jax.random.split(key, 3)
        W = _xavier(kw, branch_dims[i], branch_dims[i + 1])
        b = jax.random.uniform(kb, (1, branch_dims[i + 1]), jnp.float32, -0.05, 0.05)
        params["branch"].append((W, b))
    for i in range(len(trunk_dims) - 1):
        key, kw, kb = jax.random.split(key, 3)
        W = _xavier(kw, trunk_dims[i], trunk_dims[i + 1])
        b = jax.random.uniform(kb, (1, trunk_dims[i + 1]), jnp.float32, -0.05, 0.05)
        params["trunk"].append((W, b))
    # self.bias = nn.Parameter(torch.zeros([1])) -- scalar learnable bias
    # (given a small nonzero value so the add path is exercised numerically).
    params["bias"] = jnp.full((1, 1), 0.05, jnp.float32)
    return params


# --------------------------- one-time parameter pack --------------------------
def _trunk_tp(params, n_grid):
    """Trunk MLP ('simple'): tanh after EVERY Linear.  Input-independent."""
    yi = jnp.asarray(
        np.linspace(-np.pi, np.pi, n_grid, endpoint=False).reshape(-1, 1),
        jnp.float32)
    feats = []
    for l in range(TRUNK_FEATUREPAIR):
        m = l + 1
        feats += [jnp.cos(m * yi), jnp.sin(m * yi)]
    t = jnp.concatenate(feats, axis=-1)                       # (N, 2*fp*C)
    for W, b in params["trunk"]:
        t = jnp.tanh(t @ W + b)
    return t                                                  # (N, P)


def pack_params(params, n_grid):
    """Build kernel-ready, lane-padded, fused weights.  Call ONCE per params.

    Returns:
      bw : (4, 128, 128) stacked hidden-layer weights (layer 0 pre-scaled 1/rms)
      bb : (4, 1, 128)   stacked hidden-layer biases
      wf : (128, 128)    fused output weight = W5 @ (tp.T * rms)
      bf : (1, 128)      fused bias          = b5 @ (tp.T * rms) + bias*rms
    """
    f32 = jnp.float32
    assert n_grid <= LANE and P <= LANE and n_grid * DATA_CHANNEL <= LANE, \
        "this padded single-tile kernel assumes feature dims <= 128"

    inv_rms = 1.0 / DATA_NORM_RMS
    bw = jnp.zeros((NUM_HIDDEN, LANE, LANE), f32)
    bb = jnp.zeros((NUM_HIDDEN, 1, LANE), f32)
    for i in range(NUM_HIDDEN):
        W, b = params["branch"][i]
        if i == 0:
            W = W * inv_rms                                   # fold u/rms pre-scale
        bw = bw.at[i, :W.shape[0], :W.shape[1]].set(W)
        bb = bb.at[i, :, :b.shape[1]].set(b)

    # Fuse:  ((h4 @ W5 + b5) @ tp.T + bias) * rms
    #      =  h4 @ (W5 @ tp.T * rms) + (b5 @ tp.T * rms + bias * rms)
    tp = _trunk_tp(params, n_grid)                            # (n_grid, P)
    W5, b5 = params["branch"][NUM_HIDDEN]
    tpt_s = tp.T * DATA_NORM_RMS                              # (P, n_grid)
    wf_small = W5 @ tpt_s                                     # (100, n_grid)
    bf_small = b5 @ tpt_s + params["bias"][0, 0] * DATA_NORM_RMS
    wf = jnp.zeros((LANE, LANE), f32).at[:wf_small.shape[0], :n_grid].set(wf_small)
    bf = jnp.zeros((1, LANE), f32).at[:, :n_grid].set(bf_small)

    return {"bw": bw, "bb": bb, "wf": wf, "bf": bf}


# --------------------------------- kernel ------------------------------------
def deeponet_kernel(u_ref, bw_ref, bb_ref, wf_ref, bf_ref, out_ref):
    """Branch MLP + fused trunk contraction for one batch tile.

    u_ref  : (TB, 128)     zero-padded branch input tile
    bw_ref : (4, 128, 128) stacked, zero-padded hidden weights (in, out)
    bb_ref : (4, 1, 128)   stacked, zero-padded hidden biases
    wf_ref : (128, 128)    fused output weight  W5 @ (tp.T * rms)
    bf_ref : (1, 128)      fused output bias    b5 @ (tp.T * rms) + bias*rms
    out_ref: (TB, 128)     lane-dense output tile (Gyi in cols [:n_grid])
    """
    f32 = jnp.float32
    h = u_ref[...]                                            # (TB, 128)

    # 4 hidden layers: Linear + tanh.  Padded lanes stay exactly zero
    # (0 @ W_pad = 0, padded bias = 0, tanh(0) = 0).
    for i in range(NUM_HIDDEN):
        h = jnp.tanh(jnp.dot(h, bw_ref[i], preferred_element_type=f32)
                     + bb_ref[i])

    # Fused output layer: branch output Linear + trunk contraction + scalar
    # bias + rms post-scale, all pre-folded into (wf, bf).  One MXU pass.
    out_ref[...] = jnp.dot(h, wf_ref[...], preferred_element_type=f32) + bf_ref[...]


# -------------------------------- wrapper -------------------------------------
def _round_up(x, m):
    return -(-x // m) * m


def _choose_tb(b8):
    """Batch-tile rows: fat tiles to amortize ~0.35us/step, but >=2 grid steps
    for large B so the 'parallel' batch axis shards across v7x's two TCs."""
    if b8 <= 256:
        return b8
    half = _round_up(-(-b8 // 2), SUBLANE)
    return min(MAX_TB, half)


@functools.partial(jax.jit)
def deeponet_forward(packed, u):
    f32 = jnp.float32
    B = u.shape[0]
    n_grid = u.shape[-2]
    in_dim = n_grid * 1  # branch input width: u[..., :1].view(B, -1)
    assert n_grid <= LANE and in_dim <= LANE

    # ----- branch input: single pad to (B_pad, 128), lane-dense --------------
    u_branch = u[..., :1].reshape(B, -1).astype(f32)          # (B, N*1)
    B8 = max(SUBLANE, _round_up(B, SUBLANE))
    TB = _choose_tb(B8)
    B_pad = _round_up(B8, TB)
    u_pad = jnp.pad(u_branch, ((0, B_pad - B), (0, LANE - in_dim)))

    bw, bb, wf, bf = packed["bw"], packed["bb"], packed["wf"], packed["bf"]

    grid = (B_pad // TB,)
    weight_bytes = 4 * (bw.size + bb.size + wf.size + bf.size)
    cost = pl.CostEstimate(
        flops=2 * B_pad * LANE * LANE * (NUM_HIDDEN + 1),
        transcendentals=B_pad * LANE * NUM_HIDDEN,
        bytes_accessed=2 * B_pad * LANE * 4 + weight_bytes,
    )

    out = pl.pallas_call(
        deeponet_kernel,
        out_shape=jax.ShapeDtypeStruct((B_pad, LANE), f32),
        grid=grid,
        in_specs=[
            pl.BlockSpec((TB, LANE), lambda i: (i, 0)),                 # u tile
            pl.BlockSpec((NUM_HIDDEN, LANE, LANE), lambda i: (0, 0, 0)),  # hidden W
            pl.BlockSpec((NUM_HIDDEN, 1, LANE), lambda i: (0, 0, 0)),     # hidden b
            pl.BlockSpec((LANE, LANE), lambda i: (0, 0)),               # fused W
            pl.BlockSpec((1, LANE), lambda i: (0, 0)),                  # fused b
        ],
        out_specs=pl.BlockSpec((TB, LANE), lambda i: (i, 0)),
        compiler_params=pltpu.CompilerParams(
            dimension_semantics=("parallel",)),   # shards batch across TCs (v7x)
        cost_estimate=cost,
    )(u_pad, bw, bb, wf, bf)

    # Strip batch/lane padding; add the trailing singleton dim.
    return out[:B, :n_grid, None]                             # (B, N, 1)


# ------------------------- pure-JAX reference (check) -------------------------
def deeponet_reference(params, u):
    B = u.shape[0]
    n_grid = u.shape[-2]
    u = (u / DATA_NORM_RMS).astype(jnp.float32)
    h = u[..., :1].reshape(B, -1)
    for i, (W, b) in enumerate(params["branch"]):
        h = h @ W + b
        if i < len(params["branch"]) - 1:
            h = jnp.tanh(h)
    bp = h
    yi = jnp.asarray(
        np.linspace(-np.pi, np.pi, n_grid, endpoint=False).reshape(-1, 1),
        jnp.float32)
    feats = []
    for l in range(TRUNK_FEATUREPAIR):
        m = l + 1
        feats += [jnp.cos(m * yi), jnp.sin(m * yi)]
    t = jnp.concatenate(feats, axis=-1)
    for (W, b) in params["trunk"]:
        t = jnp.tanh(t @ W + b)
    gyi = jnp.einsum("bp,np->bn", bp, t) + params["bias"][0, 0]
    return gyi[..., None] * DATA_NORM_RMS


# ----------------------------------- main -------------------------------------
if __name__ == "__main__":
    key = jax.random.PRNGKey(0)
    pkey, ukey = jax.random.split(key)
    params = init_params(pkey)
    u = jax.random.normal(ukey, (BATCH, N, DATA_CHANNEL), dtype=jnp.float32)

    # One-time packing (hoisted out of the per-call path).
    packed = jax.tree_util.tree_map(jax.block_until_ready, pack_params(params, N))

    out = deeponet_forward(packed, u)
    out = jax.block_until_ready(out)

    ref = deeponet_reference(params, u)
    assert out.shape == (BATCH, N, 1), out.shape
    np.testing.assert_allclose(np.asarray(out), np.asarray(ref),
                               rtol=1e-4, atol=1e-5)
    print("KERNEL_OK")
</pallas_src>

<mosaic_0001>
module attributes {stable_mosaic.version = 11 : i64} {
  func.func @deeponet_kernel(%arg0: i32, %arg1: memref<8x128xf32, #tpu.memory_space<vmem>>, %arg2: memref<4x128x128xf32, #tpu.memory_space<vmem>>, %arg3: memref<4x1x128xf32, #tpu.memory_space<vmem>>, %arg4: memref<128x128xf32, #tpu.memory_space<vmem>>, %arg5: memref<1x128xf32, #tpu.memory_space<vmem>>, %arg6: memref<8x128xf32, #tpu.memory_space<vmem>>) attributes {dimension_semantics = [#tpu.dimension_semantics<parallel>], iteration_bounds = array<i64: 1>, scalar_prefetch = 0 : i64, scratch_operands = 0 : i64, tpu.core_type = #tpu.core_type<tc>, window_params = [{transform_indices = @transform_0, window_bounds = array<i64: 8, 128>}, {pipeline_mode = #tpu.pipeline_mode<synchronous>, transform_indices = @transform_1, window_bounds = array<i64: 4, 128, 128>}, {pipeline_mode = #tpu.pipeline_mode<synchronous>, transform_indices = @transform_2, window_bounds = array<i64: 4, 1, 128>}, {pipeline_mode = #tpu.pipeline_mode<synchronous>, transform_indices = @transform_3, window_bounds = array<i64: 128, 128>}, {pipeline_mode = #tpu.pipeline_mode<synchronous>, transform_indices = @transform_4, window_bounds = array<i64: 1, 128>}, {transform_indices = @transform_5, window_bounds = array<i64: 8, 128>}]} {
    %c0 = arith.constant 0 : index
    %c0_0 = arith.constant 0 : index
    %0 = vector.load %arg1[%c0, %c0_0] : memref<8x128xf32, #tpu.memory_space<vmem>>, vector<8x128xf32>
    %c0_1 = arith.constant 0 : index
    %c0_2 = arith.constant 0 : index
    %c0_3 = arith.constant 0 : index
    %1 = vector.load %arg2[%c0_1, %c0_2, %c0_3] : memref<4x128x128xf32, #tpu.memory_space<vmem>>, vector<1x128x128xf32>
    %2 = vector.shape_cast %1 : vector<1x128x128xf32> to vector<128x128xf32>
    %cst = arith.constant dense<0.000000e+00> : vector<8x128xf32>
    %3 = tpu.matmul %0, %2, %cst {dimension_numbers = #tpu.dot_dimension_numbers<[1], [0], [0], [1], [0, 0, 1, 1], [], []>} : vector<8x128xf32>, vector<128x128xf32>, vector<8x128xf32> -> vector<8x128xf32>
    %c0_4 = arith.constant 0 : index
    %c0_5 = arith.constant 0 : index
    %c0_6 = arith.constant 0 : index
    %4 = vector.load %arg3[%c0_4, %c0_5, %c0_6] : memref<4x1x128xf32, #tpu.memory_space<vmem>>, vector<1x1x128xf32>
    %5 = vector.shape_cast %4 : vector<1x1x128xf32> to vector<1x128xf32>
    %6 = vector.broadcast %5 : vector<1x128xf32> to vector<8x128xf32>
    %7 = arith.addf %3, %6 : vector<8x128xf32>
    %8 = math.tanh %7 : vector<8x128xf32>
    %c1 = arith.constant 1 : index
    %c0_7 = arith.constant 0 : index
    %c0_8 = arith.constant 0 : index
    %9 = vector.load %arg2[%c1, %c0_7, %c0_8] : memref<4x128x128xf32, #tpu.memory_space<vmem>>, vector<1x128x128xf32>
    %10 = vector.shape_cast %9 : vector<1x128x128xf32> to vector<128x128xf32>
    %cst_9 = arith.constant dense<0.000000e+00> : vector<8x128xf32>
    %11 = tpu.matmul %8, %10, %cst_9 {dimension_numbers = #tpu.dot_dimension_numbers<[1], [0], [0], [1], [0, 0, 1, 1], [], []>} : vector<8x128xf32>, vector<128x128xf32>, vector<8x128xf32> -> vector<8x128xf32>
    %c1_10 = arith.constant 1 : index
    %c0_11 = arith.constant 0 : index
    %c0_12 = arith.constant 0 : index
    %12 = vector.load %arg3[%c1_10, %c0_11, %c0_12] : memref<4x1x128xf32, #tpu.memory_space<vmem>>, vector<1x1x128xf32>
    %13 = vector.shape_cast %12 : vector<1x1x128xf32> to vector<1x128xf32>
    %14 = vector.broadcast %13 : vector<1x128xf32> to vector<8x128xf32>
    %15 = arith.addf %11, %14 : vector<8x128xf32>
    %16 = math.tanh %15 : vector<8x128xf32>
    %c2 = arith.constant 2 : index
    %c0_13 = arith.constant 0 : index
    %c0_14 = arith.constant 0 : index
    %17 = vector.load %arg2[%c2, %c0_13, %c0_14] : memref<4x128x128xf32, #tpu.memory_space<vmem>>, vector<1x128x128xf32>
    %18 = vector.shape_cast %17 : vector<1x128x128xf32> to vector<128x128xf32>
    %cst_15 = arith.constant dense<0.000000e+00> : vector<8x128xf32>
    %19 = tpu.matmul %16, %18, %cst_15 {dimension_numbers = #tpu.dot_dimension_numbers<[1], [0], [0], [1], [0, 0, 1, 1], [], []>} : vector<8x128xf32>, vector<128x128xf32>, vector<8x128xf32> -> vector<8x128xf32>
    %c2_16 = arith.constant 2 : index
    %c0_17 = arith.constant 0 : index
    %c0_18 = arith.constant 0 : index
    %20 = vector.load %arg3[%c2_16, %c0_17, %c0_18] : memref<4x1x128xf32, #tpu.memory_space<vmem>>, vector<1x1x128xf32>
    %21 = vector.shape_cast %20 : vector<1x1x128xf32> to vector<1x128xf32>
    %22 = vector.broadcast %21 : vector<1x128xf32> to vector<8x128xf32>
    %23 = arith.addf %19, %22 : vector<8x128xf32>
    %24 = math.tanh %23 : vector<8x128xf32>
    %c3 = arith.constant 3 : index
    %c0_19 = arith.constant 0 : index
    %c0_20 = arith.constant 0 : index
    %25 = vector.load %arg2[%c3, %c0_19, %c0_20] : memref<4x128x128xf32, #tpu.memory_space<vmem>>, vector<1x128x128xf32>
    %26 = vector.shape_cast %25 : vector<1x128x128xf32> to vector<128x128xf32>
    %cst_21 = arith.constant dense<0.000000e+00> : vector<8x128xf32>
    %27 = tpu.matmul %24, %26, %cst_21 {dimension_numbers = #tpu.dot_dimension_numbers<[1], [0], [0], [1], [0, 0, 1, 1], [], []>} : vector<8x128xf32>, vector<128x128xf32>, vector<8x128xf32> -> vector<8x128xf32>
    %c3_22 = arith.constant 3 : index
    %c0_23 = arith.constant 0 : index
    %c0_24 = arith.constant 0 : index
    %28 = vector.load %arg3[%c3_22, %c0_23, %c0_24] : memref<4x1x128xf32, #tpu.memory_space<vmem>>, vector<1x1x128xf32>
    %29 = vector.shape_cast %28 : vector<1x1x128xf32> to vector<1x128xf32>
    %30 = vector.broadcast %29 : vector<1x128xf32> to vector<8x128xf32>
    %31 = arith.addf %27, %30 : vector<8x128xf32>
    %32 = math.tanh %31 : vector<8x128xf32>
    %c0_25 = arith.constant 0 : index
    %c0_26 = arith.constant 0 : index
    %33 = vector.load %arg4[%c0_25, %c0_26] : memref<128x128xf32, #tpu.memory_space<vmem>>, vector<128x128xf32>
    %cst_27 = arith.constant dense<0.000000e+00> : vector<8x128xf32>
    %34 = tpu.matmul %32, %33, %cst_27 {dimension_numbers = #tpu.dot_dimension_numbers<[1], [0], [0], [1], [0, 0, 1, 1], [], []>} : vector<8x128xf32>, vector<128x128xf32>, vector<8x128xf32> -> vector<8x128xf32>
    %c0_28 = arith.constant 0 : index
    %c0_29 = arith.constant 0 : index
    %35 = vector.load %arg5[%c0_28, %c0_29] : memref<1x128xf32, #tpu.memory_space<vmem>>, vector<1x128xf32>
    %36 = vector.broadcast %35 : vector<1x128xf32> to vector<8x128xf32>
    %37 = arith.addf %34, %36 : vector<8x128xf32>
    %c0_30 = arith.constant 0 : index
    %c0_31 = arith.constant 0 : index
    %38 = vector.load %arg6[%c0_30, %c0_31] : memref<8x128xf32, #tpu.memory_space<vmem>>, vector<8x128xf32>
    tpu.vector_store %arg6[%c0_30, %c0_31], %37 {strides = array<i32>} : memref<8x128xf32, #tpu.memory_space<vmem>>, vector<8x128xf32>,
    return
  }
  func.func @transform_0(%arg0: i32) -> (i32, i32) {
    %c0_i32 = arith.constant 0 : i32
    %c0_i32_0 = arith.constant 0 : i32
    return %arg0, %c0_i32 : i32, i32
  }
  func.func @transform_1(%arg0: i32) -> (i32, i32, i32) {
    %c0_i32 = arith.constant 0 : i32
    %c0_i32_0 = arith.constant 0 : i32
    %c0_i32_1 = arith.constant 0 : i32
    %c0_i32_2 = arith.constant 0 : i32
    return %c0_i32, %c0_i32_0, %c0_i32_1 : i32, i32, i32
  }
  func.func @transform_2(%arg0: i32) -> (i32, i32, i32) {
    %c0_i32 = arith.constant 0 : i32
    %c0_i32_0 = arith.constant 0 : i32
    %c0_i32_1 = arith.constant 0 : i32
    %c0_i32_2 = arith.constant 0 : i32
    return %c0_i32, %c0_i32_0, %c0_i32_1 : i32, i32, i32
  }
  func.func @transform_3(%arg0: i32) -> (i32, i32) {
    %c0_i32 = arith.constant 0 : i32
    %c0_i32_0 = arith.constant 0 : i32
    %c0_i32_1 = arith.constant 0 : i32
    return %c0_i32, %c0_i32_0 : i32, i32
  }
  func.func @transform_4(%arg0: i32) -> (i32, i32) {
    %c0_i32 = arith.constant 0 : i32
    %c0_i32_0 = arith.constant 0 : i32
    %c0_i32_1 = arith.constant 0 : i32
    return %c0_i32, %c0_i32_0 : i32, i32
  }
  func.func @transform_5(%arg0: i32) -> (i32, i32) {
    %c0_i32 = arith.constant 0 : i32
    %c0_i32_0 = arith.constant 0 : i32
    return %arg0, %c0_i32 : i32, i32
  }
}

</mosaic_0001>

<bundles_post_ra>
// kernel: deeponet_forward.1
= control target key start
LH: loop header
LB: loop body
LE: loop exit
PB: predicated region body
PF: predicated region fallthrough
CT: control target
= control target key end

     0   :  { %10 = vsyncpa [#allocation3], 0  ;;  %s403_s0 = inlined_call_operand.vmem [shape: f32[8,128], index: 0, kind: input, shape index: {}]   ;;  %s404_s1 = inlined_call_operand.hbm [shape: f32[4,128,128], index: 1, kind: input, shape index: {}]   ;;  %s405_s2 = inlined_call_operand.vmem [shape: f32[4,1,128], index: 2, kind: input, shape index: {}]   ;;  %s406_s3 = inlined_call_operand.hbm [shape: f32[128,128], index: 3, kind: input, shape index: {}]   ;;  %s407_s4 = inlined_call_operand.vmem [shape: f32[1,128], index: 4, kind: input, shape index: {}]   ;;  %s408_s5 = inlined_call_operand.vmem [shape: f32[8,128], index: 5, kind: output, shape index: {}]  }
   0x1   :  { %s18_s20 = sshll.u32 %s404_s1, 4  ;;  %s19_s20 = int_to_ptr.hbm [resolvable:$true] %s18_s20 }
   0x2   :  { %11 = vsyncpa [#allocation5], 0  ;;  %s342_s21 = smov [#allocation2]   ;;  %s33_s25 = sshll.u32 %s406_s3, 4  ;;  %s34_s25 = int_to_ptr.hbm [resolvable:$true] %s33_s25 }
   0x3   :  { %s20_s22 = sshll.u32 %s342_s21, 4  ;;  %s343_s26 = smov 128   ;;  %s21_s22 = int_to_ptr.vmem [resolvable:$true] %s20_s22 }
   0x4   :  { %s344_s27 = smov 8   ;;  %s345_s28 = smov [#allocation4]  }
   0x5   :  { %26 = dma.hbm_to_vmem [thread:$0]  %s19_s20, 8192, %s21_s22, [#allocation3], %s343_s26, %s343_s26, %s344_s27  }
   0x6   :  { %s35_s29 = sshll.u32 %s345_s28, 4  ;;  %s36_s29 = int_to_ptr.vmem [resolvable:$true] %s35_s29 }
   0x7   :  { %41 = dma.hbm_to_vmem [thread:$0]  %s34_s25, 2048, %s36_s29, [#allocation5], %s343_s26, %s343_s26, %s344_s27  }
   0x8   :  { %338 = dma.done.wait [#allocation3], 8192  }
   0x9   :  { %339 = vsyncadd [#allocation3], 4294959104 }
   0xa   :  { %340 = dma.done.wait [#allocation5], 2048  }
   0xb   :  { %341 = vsyncadd [#allocation5], 4294965248  ;;  %v68_v0 = vld [vmem:[#allocation2 + $0x78] sm:$0xff]  ;;  %v67_v1 = vld [vmem:[#allocation2 + $0x70] sm:$0xff] }
   0xc   :  { %73 = vmatpush.msra.mxu0 %v68_v0  ;;  %v66_v2 = vld [vmem:[#allocation2 + $0x68] sm:$0xff]  ;;  %v65_v3 = vld [vmem:[#allocation2 + $0x60] sm:$0xff]  ;;  %v110_v4 = vld [vmem:[#allocation2 + $0xf8] sm:$0xff] }
   0xd   :  { %v64_v5 = vld [vmem:[#allocation2 + $0x58] sm:$0xff]  ;;  %116 = vmatpush.msra.mxu1 %v110_v4  ;;  %v109_v6 = vld [vmem:[#allocation2 + $0xf0] sm:$0xff]  ;;  %v108_v7 = vld [vmem:[#allocation2 + $0xe8] sm:$0xff] }
   0xe   :  { %74 = vmatpush.msra.mxu0 %v67_v1  ;;  %v63_v8 = vld [vmem:[#allocation2 + $0x50] sm:$0xff]  ;;  %v62_v9 = vld [vmem:[#allocation2 + $0x48] sm:$0xff]  ;;  %v107_v10 = vld [vmem:[#allocation2 + $0xe0] sm:$0xff] }
   0xf   :  { %117 = vmatpush.msra.mxu1 %v109_v6  ;;  %v106_v11 = vld [vmem:[#allocation2 + $0xd8] sm:$0xff]  ;;  %v61_v12 = vld [vmem:[#allocation2 + $0x40] sm:$0xff]  ;;  %v105_v13 = vld [vmem:[#allocation2 + $0xd0] sm:$0xff] }
  0x10   :  { %75 = vmatpush.msra.mxu0 %v66_v2  ;;  %v60_v14 = vld [vmem:[#allocation2 + $0x38] sm:$0xff]  ;;  %v104_v15 = vld [vmem:[#allocation2 + $0xc8] sm:$0xff]  ;;  %v59_v16 = vld [vmem:[#allocation2 + $0x30] sm:$0xff] }
  0x11   :  { %118 = vmatpush.msra.mxu1 %v108_v7  ;;  %v103_v17 = vld [vmem:[#allocation2 + $0xc0] sm:$0xff]  ;;  %v58_v18 = vld [vmem:[#allocation2 + $0x28] sm:$0xff]  ;;  %v102_v19 = vld [vmem:[#allocation2 + $0xb8] sm:$0xff] }
  0x12   :  { %76 = vmatpush.msra.mxu0 %v65_v3  ;;  %v57_v20 = vld [vmem:[#allocation2 + $0x20] sm:$0xff]  ;;  %v101_v21 = vld [vmem:[#allocation2 + $0xb0] sm:$0xff]  ;;  %v56_v22 = vld [vmem:[#allocation2 + $0x18] sm:$0xff] }
  0x13   :  { %119 = vmatpush.msra.mxu1 %v107_v10  ;;  %v100_v23 = vld [vmem:[#allocation2 + $0xa8] sm:$0xff]  ;;  %v55_v24 = vld [vmem:[#allocation2 + $0x10] sm:$0xff]  ;;  %v53_v26 = vld [vmem:[#allocation2] sm:$0xff] }
  0x14   :  { %77 = vmatpush.msra.mxu0 %v64_v5  ;;  %v54_v25 = vld [vmem:[#allocation2 + $0x8] sm:$0xff]  ;;  %v52_v27 = vld [vmem:[%s403_s0] sm:$0xff]  ;;  %v98_v29 = vld [vmem:[#allocation2 + $0x98] sm:$0xff] }
  0x15   :  { %120 = vmatpush.msra.mxu1 %v106_v11  ;;  %v99_v28 = vld [vmem:[#allocation2 + $0xa0] sm:$0xff]  ;;  %v97_v30 = vld [vmem:[#allocation2 + $0x90] sm:$0xff]  ;;  %v96_v31 = vld [vmem:[#allocation2 + $0x88] sm:$0xff] }
  0x16   :  { %78 = vmatpush.msra.mxu0 %v63_v8  ;;  %v95_v32 = vld [vmem:[#allocation2 + $0x80] sm:$0xff]  ;;  %v153_v33 = vld [vmem:[#allocation2 + $0x178] sm:$0xff]  ;;  %v152_v34 = vld [vmem:[#allocation2 + $0x170] sm:$0xff] }
  0x17   :  { %121 = vmatpush.msra.mxu1 %v105_v13  ;;  %159 = vmatpush.msra.mxu2 %v153_v33  ;;  %v151_v35 = vld [vmem:[#allocation2 + $0x168] sm:$0xff]  ;;  %v150_v36 = vld [vmem:[#allocation2 + $0x160] sm:$0xff]  ;;  %v149_v37 = vld [vmem:[#allocation2 + $0x158] sm:$0xff] }
  0x18   :  { %79 = vmatpush.msra.mxu0 %v62_v9  ;;  %v148_v38 = vld [vmem:[#allocation2 + $0x150] sm:$0xff]  ;;  %v147_v39 = vld [vmem:[#allocation2 + $0x148] sm:$0xff]  ;;  %v146_v40 = vld [vmem:[#allocation2 + $0x140] sm:$0xff] }
  0x19   :  { %122 = vmatpush.msra.mxu1 %v104_v15  ;;  %160 = vmatpush.msra.mxu2 %v152_v34  ;;  %v145_v41 = vld [vmem:[#allocation2 + $0x138] sm:$0xff]  ;;  %v144_v42 = vld [vmem:[#allocation2 + $0x130] sm:$0xff]  ;;  %v143_v43 = vld [vmem:[#allocation2 + $0x128] sm:$0xff] }
  0x1a   :  { %80 = vmatpush.msra.mxu0 %v61_v12  ;;  %v277_v44 = vld [vmem:[%s405_s2] ss:$0 sm:$0xff]  ;;  %v141_v49 = vld [vmem:[#allocation2 + $0x118] sm:$0xff]  ;;  %v140_v50 = vld [vmem:[#allocation2 + $0x110] sm:$0xff] }
  0x1b   :  { %123 = vmatpush.msra.mxu1 %v103_v17  ;;  %161 = vmatpush.msra.mxu2 %v151_v35  ;;  %v142_v48 = vld [vmem:[#allocation2 + $0x120] sm:$0xff]  ;;  %v139_v51 = vld [vmem:[#allocation2 + $0x108] sm:$0xff]  ;;  %v196_v53 = vld [vmem:[#allocation2 + $0x1f8] sm:$0xff] }
  0x1c   :  { %81 = vmatpush.msra.mxu0 %v60_v14  ;;  %v138_v52 = vld [vmem:[#allocation2 + $0x100] sm:$0xff]  ;;  %v195_v54 = vld [vmem:[#allocation2 + $0x1f0] sm:$0xff]  ;;  %202 = vmatpush.msra.mxu3 %v196_v53  ;;  %v194_v55 = vld [vmem:[#allocation2 + $0x1e8] sm:$0xff] }
  0x1d   :  { %124 = vmatpush.msra.mxu1 %v102_v19  ;;  %162 = vmatpush.msra.mxu2 %v150_v36  ;;  %v193_v56 = vld [vmem:[#allocation2 + $0x1e0] sm:$0xff]  ;;  %v192_v57 = vld [vmem:[#allocation2 + $0x1d8] sm:$0xff]  ;;  %v191_v58 = vld [vmem:[#allocation2 + $0x1d0] sm:$0xff] }
  0x1e   :  { %82 = vmatpush.msra.mxu0 %v59_v16  ;;  %203 = vmatpush.msra.mxu3 %v195_v54  ;;  %v190_v59 = vld [vmem:[#allocation2 + $0x1c8] sm:$0xff]  ;;  %v189_v60 = vld [vmem:[#allocation2 + $0x1c0] sm:$0xff]  ;;  %v188_v61 = vld [vmem:[#allocation2 + $0x1b8] sm:$0xff] }
  0x1f   :  { %125 = vmatpush.msra.mxu1 %v101_v21  ;;  %163 = vmatpush.msra.mxu2 %v149_v37  ;;  %v187_v62 = vld [vmem:[#allocation2 + $0x1b0] sm:$0xff]  ;;  %v186_v63 = vld [vmem:[#allocation2 + $0x1a8] sm:$0xff]  ;;  %v278_v0 = vld [vmem:[%s405_s2 + $0x1] ss:$0 sm:$0xff] }
  0x20   :  { %83 = vmatpush.msra.mxu0 %v58_v18  ;;  %204 = vmatpush.msra.mxu3 %v194_v55  ;;  %v185_v4 = vld [vmem:[#allocation2 + $0x1a0] sm:$0xff]  ;;  %v184_v5 = vld [vmem:[#allocation2 + $0x198] sm:$0xff]  ;;  %v183_v6 = vld [vmem:[#allocation2 + $0x190] sm:$0xff] }
  0x21   :  { %126 = vmatpush.msra.mxu1 %v100_v23  ;;  %164 = vmatpush.msra.mxu2 %v148_v38  ;;  %v182_v7 = vld [vmem:[#allocation2 + $0x188] sm:$0xff]  ;;  %v181_v8 = vld [vmem:[#allocation2 + $0x180] sm:$0xff]  ;;  %v238_v9 = vld [vmem:[#allocation4 + $0x78] sm:$0xff] }
  0x22   :  { %84 = vmatpush.msra.mxu0 %v57_v20  ;;  %205 = vmatpush.msra.mxu3 %v193_v56  ;;  %v237_v10 = vld [vmem:[#allocation4 + $0x70] sm:$0xff]  ;;  %v236_v11 = vld [vmem:[#allocation4 + $0x68] sm:$0xff]  ;;  %v235_v12 = vld [vmem:[#allocation4 + $0x60] sm:$0xff] }
  0x23   :  { %127 = vmatpush.msra.mxu1 %v99_v28  ;;  %165 = vmatpush.msra.mxu2 %v147_v39  ;;  %v234_v13 = vld [vmem:[#allocation4 + $0x58] sm:$0xff]  ;;  %v233_v14 = vld [vmem:[#allocation4 + $0x50] sm:$0xff]  ;;  %v232_v15 = vld [vmem:[#allocation4 + $0x48] sm:$0xff] }
  0x24   :  { %85 = vmatpush.msra.mxu0 %v56_v22  ;;  %206 = vmatpush.msra.mxu3 %v192_v57  ;;  %v231_v16 = vld [vmem:[#allocation4 + $0x40] sm:$0xff]  ;;  %v230_v17 = vld [vmem:[#allocation4 + $0x38] sm:$0xff]  ;;  %v229_v18 = vld [vmem:[#allocation4 + $0x30] sm:$0xff] }
  0x25   :  { %128 = vmatpush.msra.mxu1 %v98_v29  ;;  %166 = vmatpush.msra.mxu2 %v146_v40  ;;  %v228_v19 = vld [vmem:[#allocation4 + $0x28] sm:$0xff]  ;;  %v279_v20 = vld [vmem:[%s405_s2 + $0x2] ss:$0 sm:$0xff]  ;;  %v280_v29 = vld [vmem:[%s405_s2 + $0x3] ss:$0 sm:$0xff] }
  0x26   :  { %86 = vmatpush.msra.mxu0 %v55_v24  ;;  %207 = vmatpush.msra.mxu3 %v191_v58  ;;  %v227_v24 = vld [vmem:[#allocation4 + $0x20] sm:$0xff] }
  0x27   :  { %129 = vmatpush.msra.mxu1 %v97_v30  ;;  %167 = vmatpush.msra.mxu2 %v145_v41  ;;  %v223_v28 = vld [vmem:[#allocation4] sm:$0xff] }
  0x28   :  { %87 = vmatpush.msra.mxu0 %v54_v25  ;;  %208 = vmatpush.msra.mxu3 %v190_v59  ;;  %v226_v25 = vld [vmem:[#allocation4 + $0x18] sm:$0xff]  ;;  %v281_v33 = vld [vmem:[%s407_s4] ss:$0 sm:$0xff] }
  0x29   :  { %130 = vmatpush.msra.mxu1 %v96_v31  ;;  %168 = vmatpush.msra.mxu2 %v144_v42 }
  0x2a   :  { %88 = vmatpush.msra.mxu0 %v53_v26  ;;  %209 = vmatpush.msra.mxu3 %v189_v60  ;;  %v225_v26 = vld [vmem:[#allocation4 + $0x10] sm:$0xff] }
  0x2b   :  { %89 = vmatmul.f32.vlgmr.msra.gmra.mxu0 %v52_v27  ;;  %131 = vmatpush.msra.mxu1 %v95_v32  ;;  %v224_v27 = vld [vmem:[#allocation4 + $0x8] sm:$0xff] }
  0x2c   :  { %169 = vmatpush.msra.mxu2 %v143_v43  ;;  %210 = vmatpush.msra.mxu3 %v188_v61 }
  0x2d   :  { %243 = vmatpush.msrb.mxu0 %v238_v9 }
  0x2e   :  { %170 = vmatpush.msra.mxu2 %v142_v48  ;;  %211 = vmatpush.msra.mxu3 %v187_v62 }
  0x2f   :  { %244 = vmatpush.msrb.mxu0 %v237_v10 }
  0x30   :  { %171 = vmatpush.msra.mxu2 %v141_v49  ;;  %212 = vmatpush.msra.mxu3 %v186_v63 }
  0x31   :  { %245 = vmatpush.msrb.mxu0 %v236_v11 }
  0x32   :  { %172 = vmatpush.msra.mxu2 %v140_v50  ;;  %213 = vmatpush.msra.mxu3 %v185_v4 }
  0x33   :  { %246 = vmatpush.msrb.mxu0 %v235_v12 }
  0x34   :  { %173 = vmatpush.msra.mxu2 %v139_v51  ;;  %214 = vmatpush.msra.mxu3 %v184_v5 }
  0x35   :  { %247 = vmatpush.msrb.mxu0 %v234_v13 }
  0x36   :  { %174 = vmatpush.msra.mxu2 %v138_v52  ;;  %215 = vmatpush.msra.mxu3 %v183_v6 }
  0x37   :  { %248 = vmatpush.msrb.mxu0 %v233_v14 }
  0x38   :  { %216 = vmatpush.msra.mxu3 %v182_v7 }
  0x39   :  { %249 = vmatpush.msrb.mxu0 %v232_v15 }
  0x3a   :  { %217 = vmatpush.msra.mxu3 %v181_v8 }
  0x3b   :  { %250 = vmatpush.msrb.mxu0 %v231_v16 }
  0x3d   :  { %251 = vmatpush.msrb.mxu0 %v230_v17 }
  0x3f   :  { %252 = vmatpush.msrb.mxu0 %v229_v18 }
  0x41   :  { %253 = vmatpush.msrb.mxu0 %v228_v19 }
  0x43   :  { %254 = vmatpush.msrb.mxu0 %v227_v24 }
  0x45   :  { %255 = vmatpush.msrb.mxu0 %v226_v25 }
  0x47   :  { %256 = vmatpush.msrb.mxu0 %v225_v26 }
  0x49   :  { %257 = vmatpush.msrb.mxu0 %v224_v27 }
  0x4b   :  { %258 = vmatpush.msrb.mxu0 %v223_v28 }
  0xa8   :  { %v90_v45 = vpop.f32.mrf.mxu0 }
  0xa9   :  { %v91_v46 = vadd.f32 %v277_v44, %v90_v45 }
  0xab   :  { %282 = vtanh.f32 %v91_v46 }
  0xb1   :  { %v283_v47 = vpop.eup %282 }
  0xb2   :  { %132 = vmatmul.f32.vlgmr.msra.gmra.mxu1 %v283_v47 }
 0x12f   :  { %v133_v1 = vpop.f32.mrf.mxu1 }
 0x130   :  { %v134_v2 = vadd.f32 %v278_v0, %v133_v1 }
 0x132   :  { %284 = vtanh.f32 %v134_v2 }
 0x138   :  { %v285_v3 = vpop.eup %284 }
 0x139   :  { %175 = vmatmul.f32.vlgmr.msra.gmra.mxu2 %v285_v3 }
 0x1bc   :  { %v176_v21 = vpop.f32.mrf.mxu2 }
 0x1bd   :  { %v177_v22 = vadd.f32 %v279_v20, %v176_v21 }
 0x1bf   :  { %286 = vtanh.f32 %v177_v22 }
 0x1c5   :  { %v287_v23 = vpop.eup %286 }
 0x1c6   :  { %218 = vmatmul.f32.vlgmr.msra.gmra.mxu3 %v287_v23 }
 0x249   :  { %v219_v30 = vpop.f32.mrf.mxu3 }
 0x24a   :  { %v220_v31 = vadd.f32 %v280_v29, %v219_v30 }
 0x24c   :  { %288 = vtanh.f32 %v220_v31 }
 0x252   :  { %v289_v32 = vpop.eup %288 }
 0x253   :  { %259 = vmatmul.f32.vlgmr.msrb.gmra.mxu0 %v289_v32 }
 0x2d0   :  { %v260_v34 = vpop.f32.mrf.mxu0 }
 0x2d1   :  { %v261_v35 = vadd.f32 %v281_v33, %v260_v34 }
 0x2d3   :  { %263 = vst [vmem:[%s408_s5] sm:$0xff] %v261_v35 }
 0x2d4   :  { %268 = vsyncpa [#allocation3], 1 }
 0x2d5   :  { %269 = vsyncpa [#allocation5], 1 }

</bundles_post_ra>
